<compile_context>
chip_gen: v7x
topology: tpu7x:2x2x1
jax: 0.10.0
libtpu: 0.0.40
codegen_flags: <defaults>
</compile_context>

<pallas_src>
import functools

import jax
import jax.numpy as jnp
from jax.experimental import pallas as pl
from jax.experimental.pallas import tpu as pltpu

HIDDEN = 256
MIN_LOG_STDEV = -5.0
MAX_LOG_STDEV = 2.0


def _round_up(x, m):
    return ((x + m - 1) // m) * m


def _policy_kernel(head_half, s_ref, w1_ref, b1_ref, w2_ref, b2_ref,
                   wh_ref, bh_ref, o_ref):
    # Hidden layer 1: bf16 MXU matmul (s already bf16), f32 acc, f32 bias+ReLU.
    x = jnp.dot(s_ref[...], w1_ref[...], preferred_element_type=jnp.float32)
    x = jnp.maximum(x + b1_ref[...], 0.0)

    # Hidden layer 2.
    x = jnp.dot(x.astype(jnp.bfloat16), w2_ref[...],
                preferred_element_type=jnp.float32)
    x = jnp.maximum(x + b2_ref[...], 0.0)

    # Fused heads: lanes [0, head_half) = mean head, lanes
    # [head_half, 2*head_half) = raw log-stdev head (both zero padded).
    raw = jnp.dot(x.astype(jnp.bfloat16), wh_ref[...],
                  preferred_element_type=jnp.float32) + bh_ref[...]

    scale = 0.5 * (MAX_LOG_STDEV - MIN_LOG_STDEV)
    shift = 0.5 * (MAX_LOG_STDEV + MIN_LOG_STDEV)
    squashed = scale * jnp.tanh(raw) + shift          # EUP; free filler

    # Per-lane select: mean lanes pass through, log-stdev lanes get squashed.
    col = jax.lax.broadcasted_iota(jnp.int32, raw.shape, dimension=1)
    o_ref[...] = jnp.where(col >= head_half, squashed, raw).astype(o_ref.dtype)


def prepare_params(params):
    """One-time parameter prep: fused lane-dense head + bf16 weight casts.

    Call once per parameter update (e.g. after each optimizer step), NOT per
    forward call. Returns (prep_arrays_dict, out_dim).
    """
    out_dim = params["w31"].shape[1]
    # Each head padded to a multiple of 64 lanes so the combined slab is a
    # multiple of 128 lanes -> unmasked lane-dense stores.
    head_half = _round_up(max(out_dim, 1), 64)
    head_pad = 2 * head_half

    w_head = jnp.zeros((HIDDEN, head_pad), jnp.bfloat16)
    w_head = w_head.at[:, :out_dim].set(params["w31"].astype(jnp.bfloat16))
    w_head = w_head.at[:, head_half:head_half + out_dim].set(
        params["w32"].astype(jnp.bfloat16))
    b_head = jnp.zeros((1, head_pad), jnp.float32)
    b_head = b_head.at[:, :out_dim].set(params["b31"].astype(jnp.float32))
    b_head = b_head.at[:, head_half:head_half + out_dim].set(
        params["b32"].astype(jnp.float32))

    prep = {
        "w1": params["w1"].astype(jnp.bfloat16),
        "b1": params["b1"].astype(jnp.float32),
        "w2": params["w2"].astype(jnp.bfloat16),
        "b2": params["b2"].astype(jnp.float32),
        "w_head": w_head,
        "b_head": b_head,
    }
    return prep, out_dim


def _choose_tile(B):
    """Pick the batch tile TB.

    Small batches (action selection): one tile, zero extra grid steps.
    Large batches: big tiles (multiple of 128 for clean MXU passes on v5e,
    capped at 2048) while keeping ~4 grid steps so the "parallel" axis shards
    across both TensorCores on v7x and per-step overhead stays amortized.
    """
    B16 = _round_up(B, 16)           # 16-row sublane packing for bf16 tiles
    if B16 <= 256:
        return B16
    tb = _round_up(B16 // 4, 128)
    return max(256, min(tb, 2048))


@functools.partial(jax.jit, static_argnames=("out_dim",))
def policy_net_forward(s, prep, *, out_dim):
    """policyNet forward: s [B, input_dim] f32 -> (m, log_stdev) f32."""
    B, in_dim = s.shape
    head_pad = prep["w_head"].shape[1]
    head_half = head_pad // 2

    TB = _choose_tile(B)
    B_pad = _round_up(B, TB)

    s_bf = s.astype(jnp.bfloat16)                     # halve input DMA
    if B_pad != B:
        s_bf = jnp.pad(s_bf, ((0, B_pad - B), (0, 0)))
    grid = (B_pad // TB,)

    # Weights/biases keep index_map -> (0, 0): VMEM-resident across grid steps.
    in_specs = [
        pl.BlockSpec((TB, in_dim), lambda i: (i, 0)),          # s (bf16)
        pl.BlockSpec((in_dim, HIDDEN), lambda i: (0, 0)),      # w1 (bf16)
        pl.BlockSpec((1, HIDDEN), lambda i: (0, 0)),           # b1 (f32)
        pl.BlockSpec((HIDDEN, HIDDEN), lambda i: (0, 0)),      # w2 (bf16)
        pl.BlockSpec((1, HIDDEN), lambda i: (0, 0)),           # b2 (f32)
        pl.BlockSpec((HIDDEN, head_pad), lambda i: (0, 0)),    # fused head W
        pl.BlockSpec((1, head_pad), lambda i: (0, 0)),         # fused head b
    ]
    out_specs = pl.BlockSpec((TB, head_pad), lambda i: (i, 0))

    flops = 2 * B_pad * (in_dim * HIDDEN + HIDDEN * HIDDEN + HIDDEN * head_pad)
    bytes_accessed = (s_bf.size * 2
                      + prep["w1"].size * 2 + prep["w2"].size * 2
                      + prep["w_head"].size * 2
                      + (prep["b1"].size + prep["b2"].size
                         + prep["b_head"].size) * 4
                      + B_pad * head_pad * 2)
    cost = pl.CostEstimate(flops=flops,
                           transcendentals=B_pad * head_pad,
                           bytes_accessed=bytes_accessed)

    out = pl.pallas_call(
        functools.partial(_policy_kernel, head_half),
        out_shape=jax.ShapeDtypeStruct((B_pad, head_pad), jnp.bfloat16),
        grid=grid,
        in_specs=in_specs,
        out_specs=out_specs,
        compiler_params=pltpu.CompilerParams(
            dimension_semantics=("parallel",)),
        cost_estimate=cost,
    )(s_bf, prep["w1"], prep["b1"], prep["w2"], prep["b2"],
      prep["w_head"], prep["b_head"])

    # Wrapper-side slicing/upcast of the lane-dense slab (layout plumbing).
    m = out[:B, :out_dim].astype(jnp.float32)
    log_stdev = out[:B, head_half:head_half + out_dim].astype(jnp.float32)
    return m, log_stdev


def init_params(key, input_dim, output_dim):
    """Deterministic synthetic init mirroring the PyTorch module's shapes.

    l1: Linear(input_dim, 256), l2: Linear(256, 256),
    l31/l32: Linear(256, output_dim) with uniform(-0.003, 0.003) init.
    Weights are stored as [in, out] (transpose of PyTorch's [out, in]).
    """
    k = jax.random.split(key, 8)

    def uni(kk, shape, bound):
        return jax.random.uniform(kk, shape, jnp.float32, -bound, bound)

    b1_bound = 1.0 / jnp.sqrt(jnp.float32(input_dim))
    b2_bound = 1.0 / jnp.sqrt(jnp.float32(HIDDEN))

    return {
        "w1": uni(k[0], (input_dim, HIDDEN), b1_bound),
        "b1": uni(k[1], (1, HIDDEN), b1_bound),
        "w2": uni(k[2], (HIDDEN, HIDDEN), b2_bound),
        "b2": uni(k[3], (1, HIDDEN), b2_bound),
        "w31": uni(k[4], (HIDDEN, output_dim), 0.003),
        "b31": uni(k[5], (1, output_dim), 0.003),
        "w32": uni(k[6], (HIDDEN, output_dim), 0.003),
        "b32": uni(k[7], (1, output_dim), 0.003),
    }


def _reference_forward(s, p):
    """Pure-JAX f32 reference for a correctness check."""
    x = jnp.maximum(s @ p["w1"] + p["b1"], 0.0)
    x = jnp.maximum(x @ p["w2"] + p["b2"], 0.0)
    m = x @ p["w31"] + p["b31"]
    raw = x @ p["w32"] + p["b32"]
    ls = 0.5 * (MAX_LOG_STDEV - MIN_LOG_STDEV) * jnp.tanh(raw) \
        + 0.5 * (MAX_LOG_STDEV + MIN_LOG_STDEV)
    return m, ls


# TODO(synk): sample_action / get_prob / SAC-loss helpers use torch.distributions
# sampling and are host-side logic, not part of the forward pass kernel.

if __name__ == "__main__":
    key = jax.random.PRNGKey(0)
    k_params, k_state = jax.random.split(key)

    batch = 2
    input_dim = 8     # state dimension
    output_dim = 4    # action dimension

    params = init_params(k_params, input_dim, output_dim)
    s = jax.random.normal(k_state, (batch, input_dim), jnp.float32)

    # One-time parameter prep (hoisted out of the per-call path).
    prep, out_dim = prepare_params(params)
    prep = jax.tree_util.tree_map(jax.block_until_ready, prep)

    m, log_stdev = policy_net_forward(s, prep, out_dim=out_dim)
    jax.block_until_ready((m, log_stdev))

    # Sanity-check against pure-JAX f32 reference (bf16 matmul/store => looser tol).
    m_ref, ls_ref = _reference_forward(s, params)
    assert m.shape == (batch, output_dim)
    assert log_stdev.shape == (batch, output_dim)
    assert jnp.allclose(m, m_ref, atol=2e-2, rtol=2e-2)
    assert jnp.allclose(log_stdev, ls_ref, atol=2e-2, rtol=2e-2)
    assert bool(jnp.all(log_stdev >= MIN_LOG_STDEV))
    assert bool(jnp.all(log_stdev <= MAX_LOG_STDEV))

    print("KERNEL_OK")
</pallas_src>

<mosaic_0001>
module attributes {stable_mosaic.version = 11 : i64} {
  func.func @_policy_kernel(%arg0: i32, %arg1: memref<16x8xbf16, #tpu.memory_space<vmem>>, %arg2: memref<8x256xbf16, #tpu.memory_space<vmem>>, %arg3: memref<1x256xf32, #tpu.memory_space<vmem>>, %arg4: memref<256x256xbf16, #tpu.memory_space<vmem>>, %arg5: memref<1x256xf32, #tpu.memory_space<vmem>>, %arg6: memref<256x128xbf16, #tpu.memory_space<vmem>>, %arg7: memref<1x128xf32, #tpu.memory_space<vmem>>, %arg8: memref<16x128xbf16, #tpu.memory_space<vmem>>) attributes {dimension_semantics = [#tpu.dimension_semantics<parallel>], iteration_bounds = array<i64: 1>, scalar_prefetch = 0 : i64, scratch_operands = 0 : i64, tpu.core_type = #tpu.core_type<tc>, window_params = [{transform_indices = @transform_0, window_bounds = array<i64: 16, 8>}, {pipeline_mode = #tpu.pipeline_mode<synchronous>, transform_indices = @transform_1, window_bounds = array<i64: 8, 256>}, {pipeline_mode = #tpu.pipeline_mode<synchronous>, transform_indices = @transform_2, window_bounds = array<i64: 1, 256>}, {pipeline_mode = #tpu.pipeline_mode<synchronous>, transform_indices = @transform_3, window_bounds = array<i64: 256, 256>}, {pipeline_mode = #tpu.pipeline_mode<synchronous>, transform_indices = @transform_4, window_bounds = array<i64: 1, 256>}, {pipeline_mode = #tpu.pipeline_mode<synchronous>, transform_indices = @transform_5, window_bounds = array<i64: 256, 128>}, {pipeline_mode = #tpu.pipeline_mode<synchronous>, transform_indices = @transform_6, window_bounds = array<i64: 1, 128>}, {transform_indices = @transform_7, window_bounds = array<i64: 16, 128>}]} {
    %c0 = arith.constant 0 : index
    %c0_0 = arith.constant 0 : index
    %0 = vector.load %arg1[%c0, %c0_0] : memref<16x8xbf16, #tpu.memory_space<vmem>>, vector<16x8xbf16>
    %c0_1 = arith.constant 0 : index
    %c0_2 = arith.constant 0 : index
    %1 = vector.load %arg2[%c0_1, %c0_2] : memref<8x256xbf16, #tpu.memory_space<vmem>>, vector<8x256xbf16>
    %cst = arith.constant dense<0.000000e+00> : vector<16x256xf32>
    %2 = tpu.matmul %0, %1, %cst {dimension_numbers = #tpu.dot_dimension_numbers<[1], [0], [0], [1], [0, 0, 1, 1], [], []>} : vector<16x8xbf16>, vector<8x256xbf16>, vector<16x256xf32> -> vector<16x256xf32>
    %c0_3 = arith.constant 0 : index
    %c0_4 = arith.constant 0 : index
    %3 = vector.load %arg3[%c0_3, %c0_4] : memref<1x256xf32, #tpu.memory_space<vmem>>, vector<1x256xf32>
    %4 = vector.broadcast %3 : vector<1x256xf32> to vector<16x256xf32>
    %5 = arith.addf %2, %4 : vector<16x256xf32>
    %cst_5 = arith.constant 0.000000e+00 : f32
    %6 = vector.broadcast %cst_5 : f32 to vector<16x256xf32>
    %7 = arith.maximumf %5, %6 : vector<16x256xf32>
    %8 = arith.truncf %7 : vector<16x256xf32> to vector<16x256xbf16>
    %c0_6 = arith.constant 0 : index
    %c0_7 = arith.constant 0 : index
    %9 = vector.load %arg4[%c0_6, %c0_7] : memref<256x256xbf16, #tpu.memory_space<vmem>>, vector<256x256xbf16>
    %cst_8 = arith.constant dense<0.000000e+00> : vector<16x256xf32>
    %10 = tpu.matmul %8, %9, %cst_8 {dimension_numbers = #tpu.dot_dimension_numbers<[1], [0], [0], [1], [0, 0, 1, 1], [], []>} : vector<16x256xbf16>, vector<256x256xbf16>, vector<16x256xf32> -> vector<16x256xf32>
    %c0_9 = arith.constant 0 : index
    %c0_10 = arith.constant 0 : index
    %11 = vector.load %arg5[%c0_9, %c0_10] : memref<1x256xf32, #tpu.memory_space<vmem>>, vector<1x256xf32>
    %12 = vector.broadcast %11 : vector<1x256xf32> to vector<16x256xf32>
    %13 = arith.addf %10, %12 : vector<16x256xf32>
    %cst_11 = arith.constant 0.000000e+00 : f32
    %14 = vector.broadcast %cst_11 : f32 to vector<16x256xf32>
    %15 = arith.maximumf %13, %14 : vector<16x256xf32>
    %16 = arith.truncf %15 : vector<16x256xf32> to vector<16x256xbf16>
    %c0_12 = arith.constant 0 : index
    %c0_13 = arith.constant 0 : index
    %17 = vector.load %arg6[%c0_12, %c0_13] : memref<256x128xbf16, #tpu.memory_space<vmem>>, vector<256x128xbf16>
    %cst_14 = arith.constant dense<0.000000e+00> : vector<16x128xf32>
    %18 = tpu.matmul %16, %17, %cst_14 {dimension_numbers = #tpu.dot_dimension_numbers<[1], [0], [0], [1], [0, 0, 1, 1], [], []>} : vector<16x256xbf16>, vector<256x128xbf16>, vector<16x128xf32> -> vector<16x128xf32>
    %c0_15 = arith.constant 0 : index
    %c0_16 = arith.constant 0 : index
    %19 = vector.load %arg7[%c0_15, %c0_16] : memref<1x128xf32, #tpu.memory_space<vmem>>, vector<1x128xf32>
    %20 = vector.broadcast %19 : vector<1x128xf32> to vector<16x128xf32>
    %21 = arith.addf %18, %20 : vector<16x128xf32>
    %22 = math.tanh %21 : vector<16x128xf32>
    %cst_17 = arith.constant 3.500000e+00 : f32
    %23 = vector.broadcast %cst_17 : f32 to vector<16x128xf32>
    %24 = arith.mulf %23, %22 : vector<16x128xf32>
    %cst_18 = arith.constant -1.500000e+00 : f32
    %25 = vector.broadcast %cst_18 : f32 to vector<16x128xf32>
    %26 = arith.addf %24, %25 : vector<16x128xf32>
    %27 = tpu.iota {dimensions = array<i32: 1>} : vector<16x128xi32>
    %c64_i32 = arith.constant 64 : i32
    %28 = vector.broadcast %c64_i32 : i32 to vector<16x128xi32>
    %29 = arith.cmpi sge, %27, %28 : vector<16x128xi32>
    %30 = arith.select %29, %26, %21 : vector<16x128xi1>, vector<16x128xf32>
    %31 = arith.truncf %30 : vector<16x128xf32> to vector<16x128xbf16>
    %c0_19 = arith.constant 0 : index
    %c0_20 = arith.constant 0 : index
    %32 = vector.load %arg8[%c0_19, %c0_20] : memref<16x128xbf16, #tpu.memory_space<vmem>>, vector<16x128xbf16>
    tpu.vector_store %arg8[%c0_19, %c0_20], %31 {strides = array<i32>} : memref<16x128xbf16, #tpu.memory_space<vmem>>, vector<16x128xbf16>,
    return
  }
  func.func @transform_0(%arg0: i32) -> (i32, i32) {
    %c0_i32 = arith.constant 0 : i32
    %c0_i32_0 = arith.constant 0 : i32
    return %arg0, %c0_i32 : i32, i32
  }
  func.func @transform_1(%arg0: i32) -> (i32, i32) {
    %c0_i32 = arith.constant 0 : i32
    %c0_i32_0 = arith.constant 0 : i32
    %c0_i32_1 = arith.constant 0 : i32
    return %c0_i32, %c0_i32_0 : i32, i32
  }
  func.func @transform_2(%arg0: i32) -> (i32, i32) {
    %c0_i32 = arith.constant 0 : i32
    %c0_i32_0 = arith.constant 0 : i32
    %c0_i32_1 = arith.constant 0 : i32
    return %c0_i32, %c0_i32_0 : i32, i32
  }
  func.func @transform_3(%arg0: i32) -> (i32, i32) {
    %c0_i32 = arith.constant 0 : i32
    %c0_i32_0 = arith.constant 0 : i32
    %c0_i32_1 = arith.constant 0 : i32
    return %c0_i32, %c0_i32_0 : i32, i32
  }
  func.func @transform_4(%arg0: i32) -> (i32, i32) {
    %c0_i32 = arith.constant 0 : i32
    %c0_i32_0 = arith.constant 0 : i32
    %c0_i32_1 = arith.constant 0 : i32
    return %c0_i32, %c0_i32_0 : i32, i32
  }
  func.func @transform_5(%arg0: i32) -> (i32, i32) {
    %c0_i32 = arith.constant 0 : i32
    %c0_i32_0 = arith.constant 0 : i32
    %c0_i32_1 = arith.constant 0 : i32
    return %c0_i32, %c0_i32_0 : i32, i32
  }
  func.func @transform_6(%arg0: i32) -> (i32, i32) {
    %c0_i32 = arith.constant 0 : i32
    %c0_i32_0 = arith.constant 0 : i32
    %c0_i32_1 = arith.constant 0 : i32
    return %c0_i32, %c0_i32_0 : i32, i32
  }
  func.func @transform_7(%arg0: i32) -> (i32, i32) {
    %c0_i32 = arith.constant 0 : i32
    %c0_i32_0 = arith.constant 0 : i32
    return %arg0, %c0_i32 : i32, i32
  }
}

</mosaic_0001>

<bundles_post_ra>
// kernel: policy_net_forward.1
= control target key start
LH: loop header
LB: loop body
LE: loop exit
PB: predicated region body
PF: predicated region fallthrough
CT: control target
= control target key end

     0   :  { %12 = vsyncpa [#allocation3], 0  ;;  %s898_s0 = inlined_call_operand.vmem [shape: bf16[16,8], index: 0, kind: input, shape index: {}]   ;;  %s899_s1 = inlined_call_operand.vmem [shape: bf16[8,256], index: 1, kind: input, shape index: {}]   ;;  %s900_s2 = inlined_call_operand.vmem [shape: f32[1,256], index: 2, kind: input, shape index: {}]   ;;  %s901_s3 = inlined_call_operand.hbm [shape: bf16[256,256], index: 3, kind: input, shape index: {}]   ;;  %s902_s4 = inlined_call_operand.vmem [shape: f32[1,256], index: 4, kind: input, shape index: {}]   ;;  %s903_s5 = inlined_call_operand.hbm [shape: bf16[256,128], index: 5, kind: input, shape index: {}]   ;;  %s904_s6 = inlined_call_operand.vmem [shape: f32[1,128], index: 6, kind: input, shape index: {}]   ;;  %s905_s7 = inlined_call_operand.vmem [shape: bf16[16,128], index: 7, kind: output, shape index: {}]  }
   0x1   :  { %13 = vsyncpa [#allocation5], 0  ;;  %s807_s24 = smov [#allocation2]   ;;  %s759_s28 = scalar_lea.hbm %s901_s3, 4096 }
   0x2   :  { %s25_s25 = sshll.u32 %s807_s24, 4  ;;  %p760_p0 = scmp.ne.s32.totalorder %s901_s3, %s759_s28  ;;  %s26_s25 = int_to_ptr.vmem [resolvable:$true] %s25_s25 }
   0x3   :  { %p763_p1 = scmp.lt.u32.totalorder %s759_s28, %s901_s3 }
   0x5   :  { %p765_p2 = pnand %p763_p1, %p760_p0 }
   0x7   :  { %768 = shalt.err (!%p765_p2)
}
   0x8   :  { %s769_s10 = scalar_lea.vmem %s26_s25, 4096  ;;  %p774_p4 = scmp.lt.s32.totalorder %s26_s25, %s26_s25 }
   0x9   :  { %p770_p3 = scmp.ne.s32.totalorder %s26_s25, %s769_s10  ;;  %p775_p5 = scmp.lt.s32.totalorder %s769_s10, %s769_s10 }
   0xb   :  { %p776_p6 = por %p775_p5, %p774_p4 }
   0xd   :  { %p777_p7 = pnand %p776_p6, %p770_p3 }
   0xf   :  { %780 = shalt.err (!%p777_p7)
}
  0x10   :  { %s808_s11 = smov 128   ;;  %s809_s12 = smov 8  }
  0x11   :  { %31 = dma.hbm_to_vmem [thread:$0]  %s901_s3, 4096, %s26_s25, [#allocation3], %s808_s11, %s808_s11, %s809_s12  }
  0x12   :  { %s810_s15 = smov [#allocation4]   ;;  %s781_s19 = scalar_lea.hbm %s903_s5, 2048 }
  0x13   :  { %s39_s16 = sshll.u32 %s810_s15, 4  ;;  %p782_p8 = scmp.ne.s32.totalorder %s903_s5, %s781_s19  ;;  %s40_s16 = int_to_ptr.vmem [resolvable:$true] %s39_s16 }
  0x14   :  { %p785_p9 = scmp.lt.u32.totalorder %s781_s19, %s903_s5 }
  0x16   :  { %p787_p10 = pnand %p785_p9, %p782_p8 }
  0x18   :  { %790 = shalt.err (!%p787_p10)
}
  0x19   :  { %s791_s24 = scalar_lea.vmem %s40_s16, 2048  ;;  %p796_p12 = scmp.lt.s32.totalorder %s40_s16, %s40_s16 }
  0x1a   :  { %p792_p11 = scmp.ne.s32.totalorder %s40_s16, %s791_s24  ;;  %p797_p13 = scmp.lt.s32.totalorder %s791_s24, %s791_s24 }
  0x1c   :  { %p798_p0 = por %p797_p13, %p796_p12 }
  0x1e   :  { %p799_p1 = pnand %p798_p0, %p792_p11 }
  0x20   :  { %802 = shalt.err (!%p799_p1)
}
  0x21   :  { %s811_s3 = smov 64   ;;  %s812_s25 = smov 4  }
  0x22   :  { %45 = dma.hbm_to_vmem [thread:$0]  %s903_s5, 2048, %s40_s16, [#allocation5], %s811_s3, %s811_s3, %s812_s25  }
  0x23   :  { %803 = dma.done.wait [#allocation3], 4096  }
  0x24   :  { %804 = vsyncadd [#allocation3], 4294963200 }
  0x25   :  { %805 = dma.done.wait [#allocation5], 2048  }
  0x26   :  { %806 = vsyncadd [#allocation5], 4294965248  ;;  %v813_v0 = vmov 0   ;;  %v57_v1 = vld [vmem:[%s899_s1] sm:$0xff]  ;;  %vm84_vm0 = vcmask 1043456   ;;  %vm80_vm1 = vcmask 64512   ;;  %v60_v49 = vlaneseq }
  0x27   :  { %123 = vmatprep.mubr.bf16.mxu0 %v813_v0  ;;  %v598_v2 = vcombine.high %v57_v1, %v57_v1  ;;  %v597_v3 = vcombine.low %v57_v1, %v57_v1  ;;  %v691_v4 = vld [vmem:[#allocation2 + $0x4] ss:$8 sps:$4 sm:$0xff]   ;;  %v693_v5 = vld [vmem:[#allocation2] ss:$8 sps:$4 sm:$0xff]   ;;  %v690_v7 = vld [vmem:[%s898_s0] sm:$0xff]  }
  0x28   :  { %v694_v8 = vld [vmem:[#allocation2 + $0x14] ss:$8 sps:$4 sm:$0xff]   ;;  %344 = vmatprep.subr.bf16.mxu1 %v691_v4  ;;  %v696_v9 = vld [vmem:[#allocation2 + $0x10] ss:$8 sps:$4 sm:$0xff]   ;;  %v697_v10 = vld [vmem:[#allocation2 + $0x24] ss:$8 sps:$4 sm:$0xff]  }
  0x29   :  { %599 = vmatprep.subr.msk.bf16.mxu0 %vm84_vm0, %v598_v2  ;;  %v86_v6 = vsel %vm84_vm0, %v597_v3, 0  ;;  %345 = vmatpush1.bf16.msra.mxu1 %v693_v5  ;;  %v699_v11 = vld [vmem:[#allocation2 + $0x20] ss:$8 sps:$4 sm:$0xff]   ;;  %v700_v12 = vld [vmem:[#allocation2 + $0x34] ss:$8 sps:$4 sm:$0xff]   ;;  %v61_v50 = vshrl.u32 %v60_v49, 7 }
  0x2a   :  { %92 = vmatpush1.bf16.msra.mxu0 %v86_v6  ;;  %346 = vmatprep.subr.bf16.mxu1 %v694_v8  ;;  %v702_v13 = vld [vmem:[#allocation2 + $0x30] ss:$8 sps:$4 sm:$0xff]   ;;  %v703_v14 = vld [vmem:[#allocation2 + $0x44] ss:$8 sps:$4 sm:$0xff]   ;;  %v705_v15 = vld [vmem:[#allocation2 + $0x40] ss:$8 sps:$4 sm:$0xff]  }
  0x2b   :  { %v706_v16 = vld [vmem:[#allocation2 + $0x54] ss:$8 sps:$4 sm:$0xff]   ;;  %v708_v17 = vld [vmem:[#allocation2 + $0x50] ss:$8 sps:$4 sm:$0xff]   ;;  %v709_v18 = vld [vmem:[#allocation2 + $0x64] ss:$8 sps:$4 sm:$0xff]  }
  0x2c   :  { %v711_v19 = vld [vmem:[#allocation2 + $0x60] ss:$8 sps:$4 sm:$0xff]   ;;  %v712_v20 = vld [vmem:[#allocation2 + $0x74] ss:$8 sps:$4 sm:$0xff]   ;;  %v714_v21 = vld [vmem:[#allocation2 + $0x70] ss:$8 sps:$4 sm:$0xff]  }
  0x2d   :  { %600 = vmatmul.mubr.msk.bf16.vlgmr.msra.gmra.mrb[0].mxu0 %vm80_vm1, %v690_v7  ;;  %347 = vmatpush1.bf16.msra.mxu1 %v696_v9  ;;  %v715_v22 = vld [vmem:[#allocation2 + $0x84] ss:$8 sps:$4 sm:$0xff]   ;;  %v717_v23 = vld [vmem:[#allocation2 + $0x80] ss:$8 sps:$4 sm:$0xff]   ;;  %v718_v24 = vld [vmem:[#allocation2 + $0x94] ss:$8 sps:$4 sm:$0xff]  }
  0x2e   :  { %348 = vmatprep.subr.bf16.mxu1 %v697_v10  ;;  %v720_v25 = vld [vmem:[#allocation2 + $0x90] ss:$8 sps:$4 sm:$0xff]   ;;  %v721_v26 = vld [vmem:[#allocation2 + $0xa4] ss:$8 sps:$4 sm:$0xff]   ;;  %v723_v27 = vld [vmem:[#allocation2 + $0xa0] ss:$8 sps:$4 sm:$0xff]  }
  0x2f   :  { %v724_v28 = vld [vmem:[#allocation2 + $0xb4] ss:$8 sps:$4 sm:$0xff]   ;;  %v726_v29 = vld [vmem:[#allocation2 + $0xb0] ss:$8 sps:$4 sm:$0xff]   ;;  %v727_v30 = vld [vmem:[#allocation2 + $0xc4] ss:$8 sps:$4 sm:$0xff]  }
  0x30   :  { %v729_v31 = vld [vmem:[#allocation2 + $0xc0] ss:$8 sps:$4 sm:$0xff]   ;;  %v730_v32 = vld [vmem:[#allocation2 + $0xd4] ss:$8 sps:$4 sm:$0xff]   ;;  %v732_v33 = vld [vmem:[#allocation2 + $0xd0] ss:$8 sps:$4 sm:$0xff]  }
  0x31   :  { %349 = vmatpush1.bf16.msra.mxu1 %v699_v11  ;;  %v733_v34 = vld [vmem:[#allocation2 + $0xe4] ss:$8 sps:$4 sm:$0xff]   ;;  %v735_v35 = vld [vmem:[#allocation2 + $0xe0] ss:$8 sps:$4 sm:$0xff]   ;;  %v736_v36 = vld [vmem:[#allocation2 + $0xf4] ss:$8 sps:$4 sm:$0xff]  }
  0x32   :  { %350 = vmatprep.subr.bf16.mxu1 %v700_v12  ;;  %v738_v37 = vld [vmem:[#allocation2 + $0xf0] ss:$8 sps:$4 sm:$0xff]   ;;  %v739_v38 = vld [vmem:[#allocation4 + $0x40] sm:$0xff]   ;;  %v741_v40 = vld [vmem:[#allocation4 + $0x48] sm:$0xff]   ;;  %v62_v51 = vsub.s32 0, %v61_v50  ;;  %v66_v53 = vsub.s32 1, %v61_v50 }
  0x33   :  { %v740_v39 = vld [vmem:[#allocation4] sm:$0xff]   ;;  %659 = vmatprep.subr.bf16.mxu0 %v739_v38  ;;  %v742_v41 = vld [vmem:[#allocation4 + $0x8] sm:$0xff]   ;;  %v743_v42 = vld [vmem:[#allocation4 + $0x50] sm:$0xff]   ;;  %v576_v38 = vand.u32 127, %v60_v49 }
  0x34   :  { %660 = vmatpush3.bf16.msra.mxu0 %v740_v39  ;;  %v744_v43 = vld [vmem:[#allocation4 + $0x10] sm:$0xff]   ;;  %v745_v44 = vld [vmem:[#allocation4 + $0x58] sm:$0xff]   ;;  %v747_v46 = vld [vmem:[#allocation4 + $0x60] sm:$0xff]  }
  0x35   :  { %351 = vmatpush1.bf16.msra.mxu1 %v702_v13  ;;  %661 = vmatprep.subr.bf16.mxu0 %v741_v40  ;;  %v746_v45 = vld [vmem:[#allocation4 + $0x18] sm:$0xff]   ;;  %v748_v47 = vld [vmem:[#allocation4 + $0x20] sm:$0xff]   ;;  %v749_v48 = vld [vmem:[#allocation4 + $0x68] sm:$0xff]   ;;  %vm577_vm2 = vcmp.ge.s32.totalorder %v576_v38, 64 }
  0x36   :  { %352 = vmatprep.subr.bf16.mxu1 %v703_v14  ;;  %v58_v52 = vld [vmem:[%s900_s2] sm:$0x3]  ;;  %v750_v6 = vld [vmem:[#allocation4 + $0x28] sm:$0xff]   ;;  %v753_v9 = vld [vmem:[#allocation4 + $0x78] sm:$0xff]  }
  0x37   :  { %v63_v54 = vrot.slane %v58_v52, %v62_v51  ;;  %v67_v55 = vrot.slane %v58_v52, %v66_v53  ;;  %v751_v7 = vld [vmem:[#allocation4 + $0x70] sm:$0xff]   ;;  %v754_v10 = vld [vmem:[#allocation4 + $0x38] sm:$0xff]  }
  0x38   :  { %662 = vmatpush3.bf16.msra.mxu0 %v742_v41  ;;  %v752_v8 = vld [vmem:[#allocation4 + $0x30] sm:$0xff]  }
  0x39   :  { %353 = vmatpush1.bf16.msra.mxu1 %v705_v15  ;;  %663 = vmatprep.subr.bf16.mxu0 %v743_v42  ;;  %v172_v11 = vld [vmem:[%s902_s4] sm:$0x3] }
  0x3a   :  { %354 = vmatprep.subr.bf16.mxu1 %v706_v16  ;;  %v177_v12 = vrot.slane %v172_v11, %v62_v51  ;;  %v181_v13 = vrot.slane %v172_v11, %v66_v53 }
  0x3c   :  { %664 = vmatpush3.bf16.msra.mxu0 %v744_v43 }
  0x3d   :  { %355 = vmatpush1.bf16.msra.mxu1 %v708_v17  ;;  %665 = vmatprep.subr.bf16.mxu0 %v745_v44 }
  0x3e   :  { %356 = vmatprep.subr.bf16.mxu1 %v709_v18 }
  0x40   :  { %666 = vmatpush3.bf16.msra.mxu0 %v746_v45 }
  0x41   :  { %357 = vmatpush1.bf16.msra.mxu1 %v711_v19  ;;  %667 = vmatprep.subr.bf16.mxu0 %v747_v46 }
  0x42   :  { %358 = vmatprep.subr.bf16.mxu1 %v712_v20 }
  0x44   :  { %668 = vmatpush3.bf16.msra.mxu0 %v748_v47 }
  0x45   :  { %359 = vmatpush1.bf16.msra.mxu1 %v714_v21  ;;  %669 = vmatprep.subr.bf16.mxu0 %v749_v48 }
  0x46   :  { %360 = vmatprep.subr.bf16.mxu1 %v715_v22 }
  0x48   :  { %670 = vmatpush3.bf16.msra.mxu0 %v750_v6 }
  0x49   :  { %361 = vmatpush1.bf16.msra.mxu1 %v717_v23  ;;  %671 = vmatprep.subr.bf16.mxu0 %v751_v7 }
  0x4a   :  { %362 = vmatprep.subr.bf16.mxu1 %v718_v24 }
  0x4c   :  { %672 = vmatpush3.bf16.msra.mxu0 %v752_v8 }
  0x4d   :  { %363 = vmatpush1.bf16.msra.mxu1 %v720_v25  ;;  %673 = vmatprep.subr.bf16.mxu0 %v753_v9 }
  0x4e   :  { %364 = vmatprep.subr.bf16.mxu1 %v721_v26 }
  0x50   :  { %674 = vmatpush3.bf16.msra.mxu0 %v754_v10 }
  0x51   :  { %365 = vmatpush1.bf16.msra.mxu1 %v723_v27 }
  0x52   :  { %366 = vmatprep.subr.bf16.mxu1 %v724_v28 }
  0x55   :  { %367 = vmatpush1.bf16.msra.mxu1 %v726_v29  ;;  %v633_v29 = vld [vmem:[%s904_s6] ss:$0 sm:$0xff] }
  0x56   :  { %368 = vmatprep.subr.bf16.mxu1 %v727_v30 }
  0x59   :  { %369 = vmatpush1.bf16.msra.mxu1 %v729_v31 }
  0x5a   :  { %370 = vmatprep.subr.bf16.mxu1 %v730_v32 }
  0x5d   :  { %371 = vmatpush1.bf16.msra.mxu1 %v732_v33 }
  0x5e   :  { %372 = vmatprep.subr.bf16.mxu1 %v733_v34 }
  0x61   :  { %373 = vmatpush1.bf16.msra.mxu1 %v735_v35 }
  0x62   :  { %374 = vmatprep.subr.bf16.mxu1 %v736_v36 }
  0x65   :  { %375 = vmatpush1.bf16.msra.mxu1 %v738_v37 }
 0x100   :  { %v125_v56 = vpop.f32.mrb[0].mxu0 }
 0x101   :  { %v126_v57 = vadd.f32 %v125_v56, %v63_v54  ;;  %v127_v58 = vpop.f32.mrb[1].mxu0 }
 0x102   :  { %v128_v59 = vadd.f32 %v127_v58, %v67_v55  ;;  %v129_v60 = vpop.f32.mrb[2].mxu0 }
 0x103   :  { %v130_v61 = vadd.f32 %v129_v60, %v63_v54  ;;  %v131_v62 = vpop.f32.mrb[3].mxu0  ;;  %v134_v0 = vmax.f32 %v126_v57, 0.0 }
 0x104   :  { %v132_v63 = vadd.f32 %v131_v62, %v67_v55  ;;  %v135_v2 = vmax.f32 %v128_v59, 0.0 }
 0x105   :  { %v136_v1 = vmax.f32 %v130_v61, 0.0 }
 0x106   :  { %v137_v3 = vmax.f32 %v132_v63, 0.0 }
 0x107   :  { %v138_v4 = vpack.c.bf16 %v136_v1, %v134_v0 }
 0x108   :  { %v139_v5 = vpack.c.bf16 %v137_v3, %v135_v2 }
 0x10a   :  { %376 = vmatprep.mubr.bf16.mxu1 %v139_v5 }
 0x10b   :  { %377 = vmatmul.mubr.bf16.vlgmr.msra.gmra.mrb[0].mxu1 %v138_v4 }
 0x1de   :  { %v378_v14 = vpop.f32.mrb[0].mxu1 }
 0x1df   :  { %v379_v15 = vadd.f32 %v378_v14, %v177_v12  ;;  %v380_v16 = vpop.f32.mrb[1].mxu1 }
 0x1e0   :  { %v381_v17 = vadd.f32 %v380_v16, %v181_v13  ;;  %v382_v18 = vpop.f32.mrb[2].mxu1 }
 0x1e1   :  { %v383_v19 = vadd.f32 %v382_v18, %v177_v12  ;;  %v384_v20 = vpop.f32.mrb[3].mxu1  ;;  %v387_v22 = vmax.f32 %v379_v15, 0.0 }
 0x1e2   :  { %v385_v21 = vadd.f32 %v384_v20, %v181_v13  ;;  %v388_v24 = vmax.f32 %v381_v17, 0.0 }
 0x1e3   :  { %v389_v23 = vmax.f32 %v383_v19, 0.0 }
 0x1e4   :  { %v390_v25 = vmax.f32 %v385_v21, 0.0 }
 0x1e5   :  { %v391_v26 = vpack.c.bf16 %v389_v23, %v387_v22 }
 0x1e6   :  { %v392_v27 = vpack.c.bf16 %v390_v25, %v388_v24 }
 0x1e8   :  { %560 = vmatprep.mubr.bf16.mxu0 %v392_v27 }
 0x1e9   :  { %561 = vmatmul.mubr.bf16.vlgmr.msra.gmra.mrb[4].mxu0 %v391_v26 }
 0x2bc   :  { %v675_v28 = vpop.f32.mrb[4].mxu0 }
 0x2bd   :  { %v676_v30 = vpop.f32.mrb[5].mxu0 }
 0x2be   :  { %v677_v31 = vadd.f32 %v676_v30, %v675_v28  ;;  %v678_v32 = vpop.f32.mrb[6].mxu0 }
 0x2bf   :  { %v679_v33 = vpop.f32.mrb[7].mxu0 }
 0x2c0   :  { %v563_v34 = vadd.f32 %v677_v31, %v633_v29  ;;  %v680_v35 = vadd.f32 %v679_v33, %v678_v32 }
 0x2c2   :  { %755 = vtanh.f32 %v563_v34  ;;  %v566_v36 = vadd.f32 %v680_v35, %v633_v29 }
 0x2c4   :  { %757 = vtanh.f32 %v566_v36 }
 0x2cc   :  { %v756_v37 = vpop.eup %755 }
 0x2cd   :  { %v571_v39 = vmul.f32 3.5, %v756_v37 }
 0x2ce   :  { %v758_v40 = vpop.eup %757 }
 0x2cf   :  { %v573_v41 = vadd.f32 -1.5, %v571_v39  ;;  %v572_v42 = vmul.f32 3.5, %v758_v40 }
 0x2d1   :  { %v574_v43 = vadd.f32 -1.5, %v572_v42  ;;  %v578_v44 = vsel %vm577_vm2, %v573_v41, %v563_v34 }
 0x2d3   :  { %v579_v45 = vsel %vm577_vm2, %v574_v43, %v566_v36 }
 0x2d4   :  { %v657_v46 = vpack.c.bf16 %v579_v45, %v578_v44 }
 0x2d6   :  { %658 = vst [vmem:[%s905_s7] sm:$0xff] %v657_v46  }
 0x2d7   :  { %594 = vsyncpa [#allocation3], 1 }
 0x2d8   :  { %595 = vsyncpa [#allocation5], 1 }

</bundles_post_ra>
